<compile_context>
chip_gen: v6e
topology: v6e:2x2x1
jax: 0.10.0
libtpu: 0.0.40
codegen_flags: <defaults>
</compile_context>

<pallas_src>
import functools
import math

import numpy as np
import jax
import jax.numpy as jnp
from jax import lax
from jax.experimental import pallas as pl
from jax.experimental.pallas import tpu as pltpu


def _softplus(x):
    # numerically-stable softplus, identical formula in kernel and reference
    return jnp.where(x > 20.0, x, jnp.log1p(jnp.exp(jnp.minimum(x, 20.0))))


# -------------------- single fused kernel (one batch per grid step) --------------------

def _fused_block_kernel(x_ref, we1_ref, be1_ref, we2_ref, be2_ref, win_ref,
                        wconv_ref, bconv_ref, wxb_ref, wxc_ref, wdtf_ref, bdt_ref,
                        at_ref, dskip_ref, wout_ref, wd1_ref, bd1_ref, wd2_ref, bd2_ref,
                        o_ref, *, seq_len, d_conv, d_inner):
    d_state = at_ref.shape[0]

    # ---- encoder MLP (Linear -> ReLU -> Linear); intermediates stay in VMEM ----
    xb = x_ref[0, :, :]                                                   # (L, input_dim)
    h = jnp.dot(xb, we1_ref[...], preferred_element_type=jnp.float32) + be1_ref[...]
    h = jnp.maximum(h, 0.0)
    h = jnp.dot(h, we2_ref[...], preferred_element_type=jnp.float32) + be2_ref[...]

    # ---- mamba in_proj: ONE merged dot, xu/z split in-register (never hits HBM) ----
    xz = jnp.dot(h, win_ref[...], preferred_element_type=jnp.float32)    # (L, 2*d_inner)
    xu = xz[:, :d_inner]
    z = xz[:, d_inner:]

    # ---- causal depthwise conv1d + SiLU; padding folded into an in-register value,
    #      taps are static slices -> no scratch, no masked sub-vreg stores ----
    if d_conv > 1:
        xpad = jnp.concatenate(
            [jnp.zeros((d_conv - 1, d_inner), jnp.float32), xu], axis=0)  # (L+K-1, d_inner)
    else:
        xpad = xu
    acc = xu * wconv_ref[d_conv - 1:d_conv, :]                            # k = d_conv-1 tap
    for k in range(d_conv - 1):                                           # tiny static unroll
        acc = acc + xpad[k:k + seq_len, :] * wconv_ref[k:k + 1, :]
    xc = acc + bconv_ref[...]
    xc = xc * jax.nn.sigmoid(xc)                                          # SiLU, (L, d_inner)

    # ---- x_proj (B, C) and dt_proj folded into x_proj at trace time + softplus ----
    b_seq = jnp.dot(xc, wxb_ref[...], preferred_element_type=jnp.float32)   # (L, d_state)
    c_seq = jnp.dot(xc, wxc_ref[...], preferred_element_type=jnp.float32)   # (L, d_state)
    delta = _softplus(jnp.dot(xc, wdtf_ref[...], preferred_element_type=jnp.float32)
                      + bdt_ref[...])                                        # (L, d_inner)

    # ---- hoist every non-recurrent op out of the time loop (independent of h) ----
    a_t = at_ref[...]                                                     # (d_state, d_inner)
    du = delta * xc                                                       # delta * u
    dA = [jnp.exp(a_t * delta[t:t + 1, :]) for t in range(seq_len)]       # EUP, off crit path
    dBu = [lax.dot_general(b_seq[t:t + 1, :], du[t:t + 1, :],
                           (((0,), (0,)), ((), ())),                      # outer product
                           preferred_element_type=jnp.float32)
           for t in range(seq_len)]                                       # off crit path

    # ---- recurrence: critical path is pure VPU mul-add; states stay in registers ----
    hstate = jnp.zeros((d_state, d_inner), jnp.float32)
    hs = []
    for t in range(seq_len):                                              # static unroll
        hstate = dA[t] * hstate + dBu[t]
        hs.append(hstate)

    # ---- readout + D-skip + SiLU(z) gate, all post-loop; no scratch, no row stores ----
    y = jnp.concatenate(
        [jnp.dot(c_seq[t:t + 1, :], hs[t], preferred_element_type=jnp.float32)
         for t in range(seq_len)], axis=0)                                # (L, d_inner)
    y = (y + xc * dskip_ref[...]) * (z * jax.nn.sigmoid(z))

    # ---- mamba out_proj + decoder MLP (Linear -> ReLU -> Linear) ----
    m = jnp.dot(y, wout_ref[...], preferred_element_type=jnp.float32)
    h2 = jnp.maximum(jnp.dot(m, wd1_ref[...], preferred_element_type=jnp.float32)
                     + bd1_ref[...], 0.0)
    o_ref[0, :, :] = (jnp.dot(h2, wd2_ref[...], preferred_element_type=jnp.float32)
                      + bd2_ref[...])


def _wspec(shape):
    # broadcast (non-tiled) weight block: full array, same block for every grid step
    return pl.BlockSpec(shape, lambda b: (0, 0))


def forward(x, p, cfg):
    B, L, input_dim = x.shape
    d_model, d_state, d_conv = cfg["d_model"], cfg["d_state"], cfg["d_conv"]
    d_inner = cfg["expand"] * d_model
    dt_rank = math.ceil(d_model / 16)
    hidden = cfg["hidden_dim"]
    out_dim = cfg["output_dim"]

    # trace-time weight prep (exactly equivalent math; avoids in-kernel work)
    Wxp_dt = p["Wxp"][:, :dt_rank]
    Wxp_B = p["Wxp"][:, dt_rank:dt_rank + d_state]
    Wxp_C = p["Wxp"][:, dt_rank + d_state:]
    Wdt_fused = Wxp_dt @ p["Wdt"]                    # (d_inner, d_inner): dt_proj folded in
    A_T = (-jnp.exp(p["A_log"])).T                   # (d_state, d_inner)
    D_row = p["D"].reshape(1, d_inner)

    kern = functools.partial(_fused_block_kernel,
                             seq_len=L, d_conv=d_conv, d_inner=d_inner)

    return pl.pallas_call(
        kern,
        grid=(B,),                                   # >=2 steps -> both TCs busy on v7x
        in_specs=[
            pl.BlockSpec((1, L, input_dim), lambda b: (b, 0, 0)),   # x (per-batch)
            _wspec((input_dim, hidden)),  _wspec((1, hidden)),      # encoder L1
            _wspec((hidden, d_model)),    _wspec((1, d_model)),     # encoder L2
            _wspec((d_model, 2 * d_inner)),                         # in_proj (merged)
            _wspec((d_conv, d_inner)),    _wspec((1, d_inner)),     # conv taps + bias
            _wspec((d_inner, d_state)),   _wspec((d_inner, d_state)),  # x_proj -> B, C
            _wspec((d_inner, d_inner)),   _wspec((1, d_inner)),     # fused dt_proj + bias
            _wspec((d_state, d_inner)),   _wspec((1, d_inner)),     # A^T, D
            _wspec((d_inner, d_model)),                             # out_proj
            _wspec((d_model, hidden)),    _wspec((1, hidden)),      # decoder L1
            _wspec((hidden, out_dim)),    _wspec((1, out_dim)),     # decoder L2
        ],
        out_specs=pl.BlockSpec((1, L, out_dim), lambda b: (b, 0, 0)),
        out_shape=jax.ShapeDtypeStruct((B, L, out_dim), jnp.float32),
        compiler_params=pltpu.CompilerParams(dimension_semantics=("parallel",)),
    )(x, p["We1"], p["be1"], p["We2"], p["be2"], p["Win"], p["Wconv"], p["bconv"],
      Wxp_B, Wxp_C, Wdt_fused, p["bdt"], A_T, D_row,
      p["Wout"], p["Wd1"], p["bd1"], p["Wd2"], p["bd2"])


# --------------------------------- pure-JAX reference ---------------------------------

def reference_forward(x, p, cfg):
    B, L, _ = x.shape
    d_model, d_state, d_conv = cfg["d_model"], cfg["d_state"], cfg["d_conv"]
    d_inner = cfg["expand"] * d_model
    dt_rank = math.ceil(d_model / 16)

    h = jnp.maximum(x @ p["We1"] + p["be1"], 0.0)
    h = h @ p["We2"] + p["be2"]

    xz = h @ p["Win"]
    xu, z = xz[..., :d_inner], xz[..., d_inner:]

    xp = jnp.pad(xu, ((0, 0), (d_conv - 1, 0), (0, 0)))
    xc = sum(xp[:, k:k + L, :] * p["Wconv"][k] for k in range(d_conv)) + p["bconv"]
    xc = xc * jax.nn.sigmoid(xc)

    xdbl = xc @ p["Wxp"]
    dt = xdbl[..., :dt_rank]
    Bseq = xdbl[..., dt_rank:dt_rank + d_state]
    Cseq = xdbl[..., dt_rank + d_state:]
    delta = _softplus(dt @ p["Wdt"] + p["bdt"])

    A = -jnp.exp(p["A_log"])                        # (d_inner, d_state)
    hstate = jnp.zeros((B, d_inner, d_state), jnp.float32)
    ys = []
    for t in range(L):
        dA = jnp.exp(delta[:, t, :, None] * A[None])
        dBu = delta[:, t, :, None] * Bseq[:, t, None, :] * xc[:, t, :, None]
        hstate = dA * hstate + dBu
        y_t = (hstate * Cseq[:, t, None, :]).sum(-1) + p["D"][None] * xc[:, t, :]
        ys.append(y_t)
    y = jnp.stack(ys, axis=1)
    y = y * (z * jax.nn.sigmoid(z))

    out_m = y @ p["Wout"]
    h2 = jnp.maximum(out_m @ p["Wd1"] + p["bd1"], 0.0)
    return h2 @ p["Wd2"] + p["bd2"]


# ---------------------------------------- params ----------------------------------------

def init_params(key, cfg):
    d_inner = cfg["expand"] * cfg["d_model"]
    dt_rank = math.ceil(cfg["d_model"] / 16)
    ks = jax.random.split(key, 16)

    def w(k, shape, scale=0.1):
        return scale * jax.random.normal(k, shape, jnp.float32)

    return dict(
        We1=w(ks[0], (cfg["input_dim"], cfg["hidden_dim"])),
        be1=w(ks[1], (1, cfg["hidden_dim"])),
        We2=w(ks[2], (cfg["hidden_dim"], cfg["d_model"])),
        be2=w(ks[3], (1, cfg["d_model"])),
        Win=w(ks[4], (cfg["d_model"], 2 * d_inner)),              # in_proj, no bias
        Wconv=w(ks[5], (cfg["d_conv"], d_inner)),                 # depthwise conv taps
        bconv=w(ks[6], (1, d_inner)),
        Wxp=w(ks[7], (d_inner, dt_rank + 2 * cfg["d_state"])),    # x_proj, no bias
        Wdt=w(ks[8], (dt_rank, d_inner)),
        bdt=w(ks[9], (1, d_inner)),
        A_log=jnp.log(jnp.broadcast_to(
            jnp.arange(1, cfg["d_state"] + 1, dtype=jnp.float32),
            (d_inner, cfg["d_state"]))),
        D=jnp.ones((d_inner,), jnp.float32),
        Wout=w(ks[10], (d_inner, cfg["d_model"])),                # out_proj, no bias
        Wd1=w(ks[11], (cfg["d_model"], cfg["hidden_dim"])),
        bd1=w(ks[12], (1, cfg["hidden_dim"])),
        Wd2=w(ks[13], (cfg["hidden_dim"], cfg["output_dim"])),
        bd2=w(ks[14], (1, cfg["output_dim"])),
    )


# ----------------------------------------- main -----------------------------------------

if __name__ == "__main__":
    cfg = dict(input_dim=4, hidden_dim=32, output_dim=4,
               d_model=16, d_state=8, d_conv=4, expand=2)
    B, L = 2, 8

    key = jax.random.PRNGKey(0)
    kx, kp = jax.random.split(key)
    x = jax.random.normal(kx, (B, L, cfg["input_dim"]), jnp.float32)
    params = init_params(kp, cfg)

    fwd = jax.jit(functools.partial(forward, cfg=cfg))
    out = jax.block_until_ready(fwd(x, params))

    ref = reference_forward(x, params, cfg)
    np.testing.assert_allclose(np.asarray(out), np.asarray(ref),
                               rtol=2e-3, atol=2e-3)
    print("KERNEL_OK")
</pallas_src>

<mosaic_0001>
module attributes {stable_mosaic.version = 11 : i64} {
  func.func @_fused_block_kernel(%arg0: i32, %arg1: memref<1x8x4xf32, #tpu.memory_space<vmem>>, %arg2: memref<4x32xf32, #tpu.memory_space<vmem>>, %arg3: memref<1x32xf32, #tpu.memory_space<vmem>>, %arg4: memref<32x16xf32, #tpu.memory_space<vmem>>, %arg5: memref<1x16xf32, #tpu.memory_space<vmem>>, %arg6: memref<16x64xf32, #tpu.memory_space<vmem>>, %arg7: memref<4x32xf32, #tpu.memory_space<vmem>>, %arg8: memref<1x32xf32, #tpu.memory_space<vmem>>, %arg9: memref<32x8xf32, #tpu.memory_space<vmem>>, %arg10: memref<32x8xf32, #tpu.memory_space<vmem>>, %arg11: memref<32x32xf32, #tpu.memory_space<vmem>>, %arg12: memref<1x32xf32, #tpu.memory_space<vmem>>, %arg13: memref<8x32xf32, #tpu.memory_space<vmem>>, %arg14: memref<1x32xf32, #tpu.memory_space<vmem>>, %arg15: memref<32x16xf32, #tpu.memory_space<vmem>>, %arg16: memref<16x32xf32, #tpu.memory_space<vmem>>, %arg17: memref<1x32xf32, #tpu.memory_space<vmem>>, %arg18: memref<32x4xf32, #tpu.memory_space<vmem>>, %arg19: memref<1x4xf32, #tpu.memory_space<vmem>>, %arg20: memref<1x8x4xf32, #tpu.memory_space<vmem>>) attributes {dimension_semantics = [#tpu.dimension_semantics<parallel>], iteration_bounds = array<i64: 2>, scalar_prefetch = 0 : i64, scratch_operands = 0 : i64, tpu.core_type = #tpu.core_type<tc>, window_params = [{transform_indices = @transform_0, window_bounds = array<i64: 1, 8, 4>}, {pipeline_mode = #tpu.pipeline_mode<synchronous>, transform_indices = @transform_1, window_bounds = array<i64: 4, 32>}, {pipeline_mode = #tpu.pipeline_mode<synchronous>, transform_indices = @transform_2, window_bounds = array<i64: 1, 32>}, {pipeline_mode = #tpu.pipeline_mode<synchronous>, transform_indices = @transform_3, window_bounds = array<i64: 32, 16>}, {pipeline_mode = #tpu.pipeline_mode<synchronous>, transform_indices = @transform_4, window_bounds = array<i64: 1, 16>}, {pipeline_mode = #tpu.pipeline_mode<synchronous>, transform_indices = @transform_5, window_bounds = array<i64: 16, 64>}, {pipeline_mode = #tpu.pipeline_mode<synchronous>, transform_indices = @transform_6, window_bounds = array<i64: 4, 32>}, {pipeline_mode = #tpu.pipeline_mode<synchronous>, transform_indices = @transform_7, window_bounds = array<i64: 1, 32>}, {pipeline_mode = #tpu.pipeline_mode<synchronous>, transform_indices = @transform_8, window_bounds = array<i64: 32, 8>}, {pipeline_mode = #tpu.pipeline_mode<synchronous>, transform_indices = @transform_9, window_bounds = array<i64: 32, 8>}, {pipeline_mode = #tpu.pipeline_mode<synchronous>, transform_indices = @transform_10, window_bounds = array<i64: 32, 32>}, {pipeline_mode = #tpu.pipeline_mode<synchronous>, transform_indices = @transform_11, window_bounds = array<i64: 1, 32>}, {pipeline_mode = #tpu.pipeline_mode<synchronous>, transform_indices = @transform_12, window_bounds = array<i64: 8, 32>}, {pipeline_mode = #tpu.pipeline_mode<synchronous>, transform_indices = @transform_13, window_bounds = array<i64: 1, 32>}, {pipeline_mode = #tpu.pipeline_mode<synchronous>, transform_indices = @transform_14, window_bounds = array<i64: 32, 16>}, {pipeline_mode = #tpu.pipeline_mode<synchronous>, transform_indices = @transform_15, window_bounds = array<i64: 16, 32>}, {pipeline_mode = #tpu.pipeline_mode<synchronous>, transform_indices = @transform_16, window_bounds = array<i64: 1, 32>}, {pipeline_mode = #tpu.pipeline_mode<synchronous>, transform_indices = @transform_17, window_bounds = array<i64: 32, 4>}, {pipeline_mode = #tpu.pipeline_mode<synchronous>, transform_indices = @transform_18, window_bounds = array<i64: 1, 4>}, {transform_indices = @transform_19, window_bounds = array<i64: 1, 8, 4>}]} {
    %c0 = arith.constant 0 : index
    %c0_0 = arith.constant 0 : index
    %c0_1 = arith.constant 0 : index
    %0 = vector.load %arg1[%c0, %c0_0, %c0_1] : memref<1x8x4xf32, #tpu.memory_space<vmem>>, vector<1x8x4xf32>
    %1 = vector.shape_cast %0 : vector<1x8x4xf32> to vector<8x4xf32>
    %c0_2 = arith.constant 0 : index
    %c0_3 = arith.constant 0 : index
    %2 = vector.load %arg2[%c0_2, %c0_3] : memref<4x32xf32, #tpu.memory_space<vmem>>, vector<4x32xf32>
    %cst = arith.constant dense<0.000000e+00> : vector<8x32xf32>
    %3 = tpu.matmul %1, %2, %cst {dimension_numbers = #tpu.dot_dimension_numbers<[1], [0], [0], [1], [0, 0, 1, 1], [], []>} : vector<8x4xf32>, vector<4x32xf32>, vector<8x32xf32> -> vector<8x32xf32>
    %c0_4 = arith.constant 0 : index
    %c0_5 = arith.constant 0 : index
    %4 = vector.load %arg3[%c0_4, %c0_5] : memref<1x32xf32, #tpu.memory_space<vmem>>, vector<1x32xf32>
    %5 = vector.broadcast %4 : vector<1x32xf32> to vector<8x32xf32>
    %6 = arith.addf %3, %5 : vector<8x32xf32>
    %cst_6 = arith.constant 0.000000e+00 : f32
    %7 = vector.broadcast %cst_6 : f32 to vector<8x32xf32>
    %8 = arith.maximumf %6, %7 : vector<8x32xf32>
    %c0_7 = arith.constant 0 : index
    %c0_8 = arith.constant 0 : index
    %9 = vector.load %arg4[%c0_7, %c0_8] : memref<32x16xf32, #tpu.memory_space<vmem>>, vector<32x16xf32>
    %cst_9 = arith.constant dense<0.000000e+00> : vector<8x16xf32>
    %10 = tpu.matmul %8, %9, %cst_9 {dimension_numbers = #tpu.dot_dimension_numbers<[1], [0], [0], [1], [0, 0, 1, 1], [], []>} : vector<8x32xf32>, vector<32x16xf32>, vector<8x16xf32> -> vector<8x16xf32>
    %c0_10 = arith.constant 0 : index
    %c0_11 = arith.constant 0 : index
    %11 = vector.load %arg5[%c0_10, %c0_11] : memref<1x16xf32, #tpu.memory_space<vmem>>, vector<1x16xf32>
    %12 = vector.broadcast %11 : vector<1x16xf32> to vector<8x16xf32>
    %13 = arith.addf %10, %12 : vector<8x16xf32>
    %c0_12 = arith.constant 0 : index
    %c0_13 = arith.constant 0 : index
    %14 = vector.load %arg6[%c0_12, %c0_13] : memref<16x64xf32, #tpu.memory_space<vmem>>, vector<16x64xf32>
    %cst_14 = arith.constant dense<0.000000e+00> : vector<8x64xf32>
    %15 = tpu.matmul %13, %14, %cst_14 {dimension_numbers = #tpu.dot_dimension_numbers<[1], [0], [0], [1], [0, 0, 1, 1], [], []>} : vector<8x16xf32>, vector<16x64xf32>, vector<8x64xf32> -> vector<8x64xf32>
    %16 = vector.extract_strided_slice %15 {offsets = [0, 0], sizes = [8, 32], strides = [1, 1]} : vector<8x64xf32> to vector<8x32xf32>
    %17 = vector.extract_strided_slice %15 {offsets = [0, 32], sizes = [8, 32], strides = [1, 1]} : vector<8x64xf32> to vector<8x32xf32>
    %cst_15 = arith.constant 0.000000e+00 : f32
    %18 = vector.broadcast %cst_15 : f32 to vector<3x32xf32>
    %19 = tpu.concatenate %18, %16 in 0 : vector<3x32xf32>, vector<8x32xf32> -> vector<11x32xf32>
    %c3 = arith.constant 3 : index
    %c0_16 = arith.constant 0 : index
    %20 = vector.load %arg7[%c3, %c0_16] : memref<4x32xf32, #tpu.memory_space<vmem>>, vector<1x32xf32>
    %21 = vector.broadcast %20 : vector<1x32xf32> to vector<8x32xf32>
    %22 = arith.mulf %16, %21 : vector<8x32xf32>
    %23 = vector.extract_strided_slice %19 {offsets = [0, 0], sizes = [8, 32], strides = [1, 1]} : vector<11x32xf32> to vector<8x32xf32>
    %c0_17 = arith.constant 0 : index
    %c0_18 = arith.constant 0 : index
    %24 = vector.load %arg7[%c0_17, %c0_18] : memref<4x32xf32, #tpu.memory_space<vmem>>, vector<1x32xf32>
    %25 = vector.broadcast %24 : vector<1x32xf32> to vector<8x32xf32>
    %26 = arith.mulf %23, %25 : vector<8x32xf32>
    %27 = arith.addf %22, %26 : vector<8x32xf32>
    %28 = vector.extract_strided_slice %19 {offsets = [1, 0], sizes = [8, 32], strides = [1, 1]} : vector<11x32xf32> to vector<8x32xf32>
    %c1 = arith.constant 1 : index
    %c0_19 = arith.constant 0 : index
    %29 = vector.load %arg7[%c1, %c0_19] : memref<4x32xf32, #tpu.memory_space<vmem>>, vector<1x32xf32>
    %30 = vector.broadcast %29 : vector<1x32xf32> to vector<8x32xf32>
    %31 = arith.mulf %28, %30 : vector<8x32xf32>
    %32 = arith.addf %27, %31 : vector<8x32xf32>
    %33 = vector.extract_strided_slice %19 {offsets = [2, 0], sizes = [8, 32], strides = [1, 1]} : vector<11x32xf32> to vector<8x32xf32>
    %c2 = arith.constant 2 : index
    %c0_20 = arith.constant 0 : index
    %34 = vector.load %arg7[%c2, %c0_20] : memref<4x32xf32, #tpu.memory_space<vmem>>, vector<1x32xf32>
    %35 = vector.broadcast %34 : vector<1x32xf32> to vector<8x32xf32>
    %36 = arith.mulf %33, %35 : vector<8x32xf32>
    %37 = arith.addf %32, %36 : vector<8x32xf32>
    %c0_21 = arith.constant 0 : index
    %c0_22 = arith.constant 0 : index
    %38 = vector.load %arg8[%c0_21, %c0_22] : memref<1x32xf32, #tpu.memory_space<vmem>>, vector<1x32xf32>
    %39 = vector.broadcast %38 : vector<1x32xf32> to vector<8x32xf32>
    %40 = arith.addf %37, %39 : vector<8x32xf32>
    %41 = arith.negf %40 : vector<8x32xf32>
    %42 = math.exp %41 : vector<8x32xf32>
    %cst_23 = arith.constant 1.000000e+00 : f32
    %43 = vector.broadcast %cst_23 : f32 to vector<8x32xf32>
    %44 = arith.addf %43, %42 : vector<8x32xf32>
    %45 = arith.divf %43, %44 : vector<8x32xf32>
    %46 = arith.mulf %40, %45 : vector<8x32xf32>
    %c0_24 = arith.constant 0 : index
    %c0_25 = arith.constant 0 : index
    %47 = vector.load %arg9[%c0_24, %c0_25] : memref<32x8xf32, #tpu.memory_space<vmem>>, vector<32x8xf32>
    %cst_26 = arith.constant dense<0.000000e+00> : vector<8x8xf32>
    %48 = tpu.matmul %46, %47, %cst_26 {dimension_numbers = #tpu.dot_dimension_numbers<[1], [0], [0], [1], [0, 0, 1, 1], [], []>} : vector<8x32xf32>, vector<32x8xf32>, vector<8x8xf32> -> vector<8x8xf32>
    %c0_27 = arith.constant 0 : index
    %c0_28 = arith.constant 0 : index
    %49 = vector.load %arg10[%c0_27, %c0_28] : memref<32x8xf32, #tpu.memory_space<vmem>>, vector<32x8xf32>
    %cst_29 = arith.constant dense<0.000000e+00> : vector<8x8xf32>
    %50 = tpu.matmul %46, %49, %cst_29 {dimension_numbers = #tpu.dot_dimension_numbers<[1], [0], [0], [1], [0, 0, 1, 1], [], []>} : vector<8x32xf32>, vector<32x8xf32>, vector<8x8xf32> -> vector<8x8xf32>
    %c0_30 = arith.constant 0 : index
    %c0_31 = arith.constant 0 : index
    %51 = vector.load %arg11[%c0_30, %c0_31] : memref<32x32xf32, #tpu.memory_space<vmem>>, vector<32x32xf32>
    %cst_32 = arith.constant dense<0.000000e+00> : vector<8x32xf32>
    %52 = tpu.matmul %46, %51, %cst_32 {dimension_numbers = #tpu.dot_dimension_numbers<[1], [0], [0], [1], [0, 0, 1, 1], [], []>} : vector<8x32xf32>, vector<32x32xf32>, vector<8x32xf32> -> vector<8x32xf32>
    %c0_33 = arith.constant 0 : index
    %c0_34 = arith.constant 0 : index
    %53 = vector.load %arg12[%c0_33, %c0_34] : memref<1x32xf32, #tpu.memory_space<vmem>>, vector<1x32xf32>
    %54 = vector.broadcast %53 : vector<1x32xf32> to vector<8x32xf32>
    %55 = arith.addf %52, %54 : vector<8x32xf32>
    %cst_35 = arith.constant 2.000000e+01 : f32
    %56 = vector.broadcast %cst_35 : f32 to vector<8x32xf32>
    %57 = arith.cmpf ogt, %55, %56 : vector<8x32xf32>
    %cst_36 = arith.constant 2.000000e+01 : f32
    %58 = vector.broadcast %cst_36 : f32 to vector<8x32xf32>
    %59 = arith.minimumf %55, %58 : vector<8x32xf32>
    %60 = math.exp %59 : vector<8x32xf32>
    %61 = math.log1p %60 : vector<8x32xf32>
    %62 = arith.select %57, %55, %61 : vector<8x32xi1>, vector<8x32xf32>
    %c0_37 = arith.constant 0 : index
    %c0_38 = arith.constant 0 : index
    %63 = vector.load %arg13[%c0_37, %c0_38] : memref<8x32xf32, #tpu.memory_space<vmem>>, vector<8x32xf32>
    %64 = arith.mulf %62, %46 : vector<8x32xf32>
    %65 = vector.extract_strided_slice %62 {offsets = [0, 0], sizes = [1, 32], strides = [1, 1]} : vector<8x32xf32> to vector<1x32xf32>
    %66 = vector.broadcast %65 : vector<1x32xf32> to vector<8x32xf32>
    %67 = arith.mulf %63, %66 : vector<8x32xf32>
    %68 = math.exp %67 : vector<8x32xf32>
    %69 = vector.extract_strided_slice %62 {offsets = [1, 0], sizes = [1, 32], strides = [1, 1]} : vector<8x32xf32> to vector<1x32xf32>
    %70 = vector.broadcast %69 : vector<1x32xf32> to vector<8x32xf32>
    %71 = arith.mulf %63, %70 : vector<8x32xf32>
    %72 = math.exp %71 : vector<8x32xf32>
    %73 = vector.extract_strided_slice %62 {offsets = [2, 0], sizes = [1, 32], strides = [1, 1]} : vector<8x32xf32> to vector<1x32xf32>
    %74 = vector.broadcast %73 : vector<1x32xf32> to vector<8x32xf32>
    %75 = arith.mulf %63, %74 : vector<8x32xf32>
    %76 = math.exp %75 : vector<8x32xf32>
    %77 = vector.extract_strided_slice %62 {offsets = [3, 0], sizes = [1, 32], strides = [1, 1]} : vector<8x32xf32> to vector<1x32xf32>
    %78 = vector.broadcast %77 : vector<1x32xf32> to vector<8x32xf32>
    %79 = arith.mulf %63, %78 : vector<8x32xf32>
    %80 = math.exp %79 : vector<8x32xf32>
    %81 = vector.extract_strided_slice %62 {offsets = [4, 0], sizes = [1, 32], strides = [1, 1]} : vector<8x32xf32> to vector<1x32xf32>
    %82 = vector.broadcast %81 : vector<1x32xf32> to vector<8x32xf32>
    %83 = arith.mulf %63, %82 : vector<8x32xf32>
    %84 = math.exp %83 : vector<8x32xf32>
    %85 = vector.extract_strided_slice %62 {offsets = [5, 0], sizes = [1, 32], strides = [1, 1]} : vector<8x32xf32> to vector<1x32xf32>
    %86 = vector.broadcast %85 : vector<1x32xf32> to vector<8x32xf32>
    %87 = arith.mulf %63, %86 : vector<8x32xf32>
    %88 = math.exp %87 : vector<8x32xf32>
    %89 = vector.extract_strided_slice %62 {offsets = [6, 0], sizes = [1, 32], strides = [1, 1]} : vector<8x32xf32> to vector<1x32xf32>
    %90 = vector.broadcast %89 : vector<1x32xf32> to vector<8x32xf32>
    %91 = arith.mulf %63, %90 : vector<8x32xf32>
    %92 = math.exp %91 : vector<8x32xf32>
    %93 = vector.extract_strided_slice %62 {offsets = [7, 0], sizes = [1, 32], strides = [1, 1]} : vector<8x32xf32> to vector<1x32xf32>
    %94 = vector.broadcast %93 : vector<1x32xf32> to vector<8x32xf32>
    %95 = arith.mulf %63, %94 : vector<8x32xf32>
    %96 = math.exp %95 : vector<8x32xf32>
    %97 = vector.extract_strided_slice %48 {offsets = [0, 0], sizes = [1, 8], strides = [1, 1]} : vector<8x8xf32> to vector<1x8xf32>
    %98 = vector.extract_strided_slice %64 {offsets = [0, 0], sizes = [1, 32], strides = [1, 1]} : vector<8x32xf32> to vector<1x32xf32>
    %cst_39 = arith.constant dense<0.000000e+00> : vector<8x32xf32>
    %99 = tpu.matmul %97, %98, %cst_39 {dimension_numbers = #tpu.dot_dimension_numbers<[0], [0], [1], [1], [0, 1, 1, 1], [], []>} : vector<1x8xf32>, vector<1x32xf32>, vector<8x32xf32> -> vector<8x32xf32>
    %100 = vector.extract_strided_slice %48 {offsets = [1, 0], sizes = [1, 8], strides = [1, 1]} : vector<8x8xf32> to vector<1x8xf32>
    %101 = vector.extract_strided_slice %64 {offsets = [1, 0], sizes = [1, 32], strides = [1, 1]} : vector<8x32xf32> to vector<1x32xf32>
    %cst_40 = arith.constant dense<0.000000e+00> : vector<8x32xf32>
    %102 = tpu.matmul %100, %101, %cst_40 {dimension_numbers = #tpu.dot_dimension_numbers<[0], [0], [1], [1], [0, 1, 1, 1], [], []>} : vector<1x8xf32>, vector<1x32xf32>, vector<8x32xf32> -> vector<8x32xf32>
    %103 = vector.extract_strided_slice %48 {offsets = [2, 0], sizes = [1, 8], strides = [1, 1]} : vector<8x8xf32> to vector<1x8xf32>
    %104 = vector.extract_strided_slice %64 {offsets = [2, 0], sizes = [1, 32], strides = [1, 1]} : vector<8x32xf32> to vector<1x32xf32>
    %cst_41 = arith.constant dense<0.000000e+00> : vector<8x32xf32>
    %105 = tpu.matmul %103, %104, %cst_41 {dimension_numbers = #tpu.dot_dimension_numbers<[0], [0], [1], [1], [0, 1, 1, 1], [], []>} : vector<1x8xf32>, vector<1x32xf32>, vector<8x32xf32> -> vector<8x32xf32>
    %106 = vector.extract_strided_slice %48 {offsets = [3, 0], sizes = [1, 8], strides = [1, 1]} : vector<8x8xf32> to vector<1x8xf32>
    %107 = vector.extract_strided_slice %64 {offsets = [3, 0], sizes = [1, 32], strides = [1, 1]} : vector<8x32xf32> to vector<1x32xf32>
    %cst_42 = arith.constant dense<0.000000e+00> : vector<8x32xf32>
    %108 = tpu.matmul %106, %107, %cst_42 {dimension_numbers = #tpu.dot_dimension_numbers<[0], [0], [1], [1], [0, 1, 1, 1], [], []>} : vector<1x8xf32>, vector<1x32xf32>, vector<8x32xf32> -> vector<8x32xf32>
    %109 = vector.extract_strided_slice %48 {offsets = [4, 0], sizes = [1, 8], strides = [1, 1]} : vector<8x8xf32> to vector<1x8xf32>
    %110 = vector.extract_strided_slice %64 {offsets = [4, 0], sizes = [1, 32], strides = [1, 1]} : vector<8x32xf32> to vector<1x32xf32>
    %cst_43 = arith.constant dense<0.000000e+00> : vector<8x32xf32>
    %111 = tpu.matmul %109, %110, %cst_43 {dimension_numbers = #tpu.dot_dimension_numbers<[0], [0], [1], [1], [0, 1, 1, 1], [], []>} : vector<1x8xf32>, vector<1x32xf32>, vector<8x32xf32> -> vector<8x32xf32>
    %112 = vector.extract_strided_slice %48 {offsets = [5, 0], sizes = [1, 8], strides = [1, 1]} : vector<8x8xf32> to vector<1x8xf32>
    %113 = vector.extract_strided_slice %64 {offsets = [5, 0], sizes = [1, 32], strides = [1, 1]} : vector<8x32xf32> to vector<1x32xf32>
    %cst_44 = arith.constant dense<0.000000e+00> : vector<8x32xf32>
    %114 = tpu.matmul %112, %113, %cst_44 {dimension_numbers = #tpu.dot_dimension_numbers<[0], [0], [1], [1], [0, 1, 1, 1], [], []>} : vector<1x8xf32>, vector<1x32xf32>, vector<8x32xf32> -> vector<8x32xf32>
    %115 = vector.extract_strided_slice %48 {offsets = [6, 0], sizes = [1, 8], strides = [1, 1]} : vector<8x8xf32> to vector<1x8xf32>
    %116 = vector.extract_strided_slice %64 {offsets = [6, 0], sizes = [1, 32], strides = [1, 1]} : vector<8x32xf32> to vector<1x32xf32>
    %cst_45 = arith.constant dense<0.000000e+00> : vector<8x32xf32>
    %117 = tpu.matmul %115, %116, %cst_45 {dimension_numbers = #tpu.dot_dimension_numbers<[0], [0], [1], [1], [0, 1, 1, 1], [], []>} : vector<1x8xf32>, vector<1x32xf32>, vector<8x32xf32> -> vector<8x32xf32>
    %118 = vector.extract_strided_slice %48 {offsets = [7, 0], sizes = [1, 8], strides = [1, 1]} : vector<8x8xf32> to vector<1x8xf32>
    %119 = vector.extract_strided_slice %64 {offsets = [7, 0], sizes = [1, 32], strides = [1, 1]} : vector<8x32xf32> to vector<1x32xf32>
    %cst_46 = arith.constant dense<0.000000e+00> : vector<8x32xf32>
    %120 = tpu.matmul %118, %119, %cst_46 {dimension_numbers = #tpu.dot_dimension_numbers<[0], [0], [1], [1], [0, 1, 1, 1], [], []>} : vector<1x8xf32>, vector<1x32xf32>, vector<8x32xf32> -> vector<8x32xf32>
    %cst_47 = arith.constant 0.000000e+00 : f32
    %121 = vector.broadcast %cst_47 : f32 to vector<8x32xf32>
    %122 = arith.mulf %68, %121 : vector<8x32xf32>
    %123 = arith.addf %122, %99 : vector<8x32xf32>
    %124 = arith.mulf %72, %123 : vector<8x32xf32>
    %125 = arith.addf %124, %102 : vector<8x32xf32>
    %126 = arith.mulf %76, %125 : vector<8x32xf32>
    %127 = arith.addf %126, %105 : vector<8x32xf32>
    %128 = arith.mulf %80, %127 : vector<8x32xf32>
    %129 = arith.addf %128, %108 : vector<8x32xf32>
    %130 = arith.mulf %84, %129 : vector<8x32xf32>
    %131 = arith.addf %130, %111 : vector<8x32xf32>
    %132 = arith.mulf %88, %131 : vector<8x32xf32>
    %133 = arith.addf %132, %114 : vector<8x32xf32>
    %134 = arith.mulf %92, %133 : vector<8x32xf32>
    %135 = arith.addf %134, %117 : vector<8x32xf32>
    %136 = arith.mulf %96, %135 : vector<8x32xf32>
    %137 = arith.addf %136, %120 : vector<8x32xf32>
    %138 = vector.extract_strided_slice %50 {offsets = [0, 0], sizes = [1, 8], strides = [1, 1]} : vector<8x8xf32> to vector<1x8xf32>
    %cst_48 = arith.constant dense<0.000000e+00> : vector<1x32xf32>
    %139 = tpu.matmul %138, %123, %cst_48 {dimension_numbers = #tpu.dot_dimension_numbers<[1], [0], [0], [1], [0, 0, 1, 1], [], []>} : vector<1x8xf32>, vector<8x32xf32>, vector<1x32xf32> -> vector<1x32xf32>
    %140 = vector.extract_strided_slice %50 {offsets = [1, 0], sizes = [1, 8], strides = [1, 1]} : vector<8x8xf32> to vector<1x8xf32>
    %cst_49 = arith.constant dense<0.000000e+00> : vector<1x32xf32>
    %141 = tpu.matmul %140, %125, %cst_49 {dimension_numbers = #tpu.dot_dimension_numbers<[1], [0], [0], [1], [0, 0, 1, 1], [], []>} : vector<1x8xf32>, vector<8x32xf32>, vector<1x32xf32> -> vector<1x32xf32>
    %142 = vector.extract_strided_slice %50 {offsets = [2, 0], sizes = [1, 8], strides = [1, 1]} : vector<8x8xf32> to vector<1x8xf32>
    %cst_50 = arith.constant dense<0.000000e+00> : vector<1x32xf32>
    %143 = tpu.matmul %142, %127, %cst_50 {dimension_numbers = #tpu.dot_dimension_numbers<[1], [0], [0], [1], [0, 0, 1, 1], [], []>} : vector<1x8xf32>, vector<8x32xf32>, vector<1x32xf32> -> vector<1x32xf32>
    %144 = vector.extract_strided_slice %50 {offsets = [3, 0], sizes = [1, 8], strides = [1, 1]} : vector<8x8xf32> to vector<1x8xf32>
    %cst_51 = arith.constant dense<0.000000e+00> : vector<1x32xf32>
    %145 = tpu.matmul %144, %129, %cst_51 {dimension_numbers = #tpu.dot_dimension_numbers<[1], [0], [0], [1], [0, 0, 1, 1], [], []>} : vector<1x8xf32>, vector<8x32xf32>, vector<1x32xf32> -> vector<1x32xf32>
    %146 = vector.extract_strided_slice %50 {offsets = [4, 0], sizes = [1, 8], strides = [1, 1]} : vector<8x8xf32> to vector<1x8xf32>
    %cst_52 = arith.constant dense<0.000000e+00> : vector<1x32xf32>
    %147 = tpu.matmul %146, %131, %cst_52 {dimension_numbers = #tpu.dot_dimension_numbers<[1], [0], [0], [1], [0, 0, 1, 1], [], []>} : vector<1x8xf32>, vector<8x32xf32>, vector<1x32xf32> -> vector<1x32xf32>
    %148 = vector.extract_strided_slice %50 {offsets = [5, 0], sizes = [1, 8], strides = [1, 1]} : vector<8x8xf32> to vector<1x8xf32>
    %cst_53 = arith.constant dense<0.000000e+00> : vector<1x32xf32>
    %149 = tpu.matmul %148, %133, %cst_53 {dimension_numbers = #tpu.dot_dimension_numbers<[1], [0], [0], [1], [0, 0, 1, 1], [], []>} : vector<1x8xf32>, vector<8x32xf32>, vector<1x32xf32> -> vector<1x32xf32>
    %150 = vector.extract_strided_slice %50 {offsets = [6, 0], sizes = [1, 8], strides = [1, 1]} : vector<8x8xf32> to vector<1x8xf32>
    %cst_54 = arith.constant dense<0.000000e+00> : vector<1x32xf32>
    %151 = tpu.matmul %150, %135, %cst_54 {dimension_numbers = #tpu.dot_dimension_numbers<[1], [0], [0], [1], [0, 0, 1, 1], [], []>} : vector<1x8xf32>, vector<8x32xf32>, vector<1x32xf32> -> vector<1x32xf32>
    %152 = vector.extract_strided_slice %50 {offsets = [7, 0], sizes = [1, 8], strides = [1, 1]} : vector<8x8xf32> to vector<1x8xf32>
    %cst_55 = arith.constant dense<0.000000e+00> : vector<1x32xf32>
    %153 = tpu.matmul %152, %137, %cst_55 {dimension_numbers = #tpu.dot_dimension_numbers<[1], [0], [0], [1], [0, 0, 1, 1], [], []>} : vector<1x8xf32>, vector<8x32xf32>, vector<1x32xf32> -> vector<1x32xf32>
    %154 = tpu.concatenate %139, %141, %143, %145, %147, %149, %151, %153 in 0 : vector<1x32xf32>, vector<1x32xf32>, vector<1x32xf32>, vector<1x32xf32>, vector<1x32xf32>, vector<1x32xf32>, vector<1x32xf32>, vector<1x32xf32> -> vector<8x32xf32>
    %c0_56 = arith.constant 0 : index
    %c0_57 = arith.constant 0 : index
    %155 = vector.load %arg14[%c0_56, %c0_57] : memref<1x32xf32, #tpu.memory_space<vmem>>, vector<1x32xf32>
    %156 = vector.broadcast %155 : vector<1x32xf32> to vector<8x32xf32>
    %157 = arith.mulf %46, %156 : vector<8x32xf32>
    %158 = arith.addf %154, %157 : vector<8x32xf32>
    %159 = arith.negf %17 : vector<8x32xf32>
    %160 = math.exp %159 : vector<8x32xf32>
    %cst_58 = arith.constant 1.000000e+00 : f32
    %161 = vector.broadcast %cst_58 : f32 to vector<8x32xf32>
    %162 = arith.addf %161, %160 : vector<8x32xf32>
    %163 = arith.divf %161, %162 : vector<8x32xf32>
    %164 = arith.mulf %17, %163 : vector<8x32xf32>
    %165 = arith.mulf %158, %164 : vector<8x32xf32>
    %c0_59 = arith.constant 0 : index
    %c0_60 = arith.constant 0 : index
    %166 = vector.load %arg15[%c0_59, %c0_60] : memref<32x16xf32, #tpu.memory_space<vmem>>, vector<32x16xf32>
    %cst_61 = arith.constant dense<0.000000e+00> : vector<8x16xf32>
    %167 = tpu.matmul %165, %166, %cst_61 {dimension_numbers = #tpu.dot_dimension_numbers<[1], [0], [0], [1], [0, 0, 1, 1], [], []>} : vector<8x32xf32>, vector<32x16xf32>, vector<8x16xf32> -> vector<8x16xf32>
    %c0_62 = arith.constant 0 : index
    %c0_63 = arith.constant 0 : index
    %168 = vector.load %arg16[%c0_62, %c0_63] : memref<16x32xf32, #tpu.memory_space<vmem>>, vector<16x32xf32>
    %cst_64 = arith.constant dense<0.000000e+00> : vector<8x32xf32>
    %169 = tpu.matmul %167, %168, %cst_64 {dimension_numbers = #tpu.dot_dimension_numbers<[1], [0], [0], [1], [0, 0, 1, 1], [], []>} : vector<8x16xf32>, vector<16x32xf32>, vector<8x32xf32> -> vector<8x32xf32>
    %c0_65 = arith.constant 0 : index
    %c0_66 = arith.constant 0 : index
    %170 = vector.load %arg17[%c0_65, %c0_66] : memref<1x32xf32, #tpu.memory_space<vmem>>, vector<1x32xf32>
    %171 = vector.broadcast %170 : vector<1x32xf32> to vector<8x32xf32>
    %172 = arith.addf %169, %171 : vector<8x32xf32>
    %cst_67 = arith.constant 0.000000e+00 : f32
    %173 = vector.broadcast %cst_67 : f32 to vector<8x32xf32>
    %174 = arith.maximumf %172, %173 : vector<8x32xf32>
    %c0_68 = arith.constant 0 : index
    %c0_69 = arith.constant 0 : index
    %175 = vector.load %arg18[%c0_68, %c0_69] : memref<32x4xf32, #tpu.memory_space<vmem>>, vector<32x4xf32>
    %cst_70 = arith.constant dense<0.000000e+00> : vector<8x4xf32>
    %176 = tpu.matmul %174, %175, %cst_70 {dimension_numbers = #tpu.dot_dimension_numbers<[1], [0], [0], [1], [0, 0, 1, 1], [], []>} : vector<8x32xf32>, vector<32x4xf32>, vector<8x4xf32> -> vector<8x4xf32>
    %c0_71 = arith.constant 0 : index
    %c0_72 = arith.constant 0 : index
    %177 = vector.load %arg19[%c0_71, %c0_72] : memref<1x4xf32, #tpu.memory_space<vmem>>, vector<1x4xf32>
    %178 = vector.broadcast %177 : vector<1x4xf32> to vector<8x4xf32>
    %179 = arith.addf %176, %178 : vector<8x4xf32>
    %c0_73 = arith.constant 0 : index
    %c0_74 = arith.constant 0 : index
    %c0_75 = arith.constant 0 : index
    %180 = vector.load %arg20[%c0_73, %c0_74, %c0_75] : memref<1x8x4xf32, #tpu.memory_space<vmem>>, vector<1x8x4xf32>
    %181 = vector.shape_cast %180 : vector<1x8x4xf32> to vector<8x4xf32>
    %182 = vector.shape_cast %179 : vector<8x4xf32> to vector<1x8x4xf32>
    tpu.vector_store %arg20[%c0_73, %c0_74, %c0_75], %182 {strides = array<i32>} : memref<1x8x4xf32, #tpu.memory_space<vmem>>, vector<1x8x4xf32>,
    return
  }
  func.func @transform_0(%arg0: i32) -> (i32, i32, i32) {
    %c0_i32 = arith.constant 0 : i32
    %c0_i32_0 = arith.constant 0 : i32
    %c0_i32_1 = arith.constant 0 : i32
    return %arg0, %c0_i32, %c0_i32_0 : i32, i32, i32
  }
  func.func @transform_1(%arg0: i32) -> (i32, i32) {
    %c0_i32 = arith.constant 0 : i32
    %c0_i32_0 = arith.constant 0 : i32
    %c0_i32_1 = arith.constant 0 : i32
    return %c0_i32, %c0_i32_0 : i32, i32
  }
  func.func @transform_2(%arg0: i32) -> (i32, i32) {
    %c0_i32 = arith.constant 0 : i32
    %c0_i32_0 = arith.constant 0 : i32
    %c0_i32_1 = arith.constant 0 : i32
    return %c0_i32, %c0_i32_0 : i32, i32
  }
  func.func @transform_3(%arg0: i32) -> (i32, i32) {
    %c0_i32 = arith.constant 0 : i32
    %c0_i32_0 = arith.constant 0 : i32
    %c0_i32_1 = arith.constant 0 : i32
    return %c0_i32, %c0_i32_0 : i32, i32
  }
  func.func @transform_4(%arg0: i32) -> (i32, i32) {
    %c0_i32 = arith.constant 0 : i32
    %c0_i32_0 = arith.constant 0 : i32
    %c0_i32_1 = arith.constant 0 : i32
    return %c0_i32, %c0_i32_0 : i32, i32
  }
  func.func @transform_5(%arg0: i32) -> (i32, i32) {
    %c0_i32 = arith.constant 0 : i32
    %c0_i32_0 = arith.constant 0 : i32
    %c0_i32_1 = arith.constant 0 : i32
    return %c0_i32, %c0_i32_0 : i32, i32
  }
  func.func @transform_6(%arg0: i32) -> (i32, i32) {
    %c0_i32 = arith.constant 0 : i32
    %c0_i32_0 = arith.constant 0 : i32
    %c0_i32_1 = arith.constant 0 : i32
    return %c0_i32, %c0_i32_0 : i32, i32
  }
  func.func @transform_7(%arg0: i32) -> (i32, i32) {
    %c0_i32 = arith.constant 0 : i32
    %c0_i32_0 = arith.constant 0 : i32
    %c0_i32_1 = arith.constant 0 : i32
    return %c0_i32, %c0_i32_0 : i32, i32
  }
  func.func @transform_8(%arg0: i32) -> (i32, i32) {
    %c0_i32 = arith.constant 0 : i32
    %c0_i32_0 = arith.constant 0 : i32
    %c0_i32_1 = arith.constant 0 : i32
    return %c0_i32, %c0_i32_0 : i32, i32
  }
  func.func @transform_9(%arg0: i32) -> (i32, i32) {
    %c0_i32 = arith.constant 0 : i32
    %c0_i32_0 = arith.constant 0 : i32
    %c0_i32_1 = arith.constant 0 : i32
    return %c0_i32, %c0_i32_0 : i32, i32
  }
  func.func @transform_10(%arg0: i32) -> (i32, i32) {
    %c0_i32 = arith.constant 0 : i32
    %c0_i32_0 = arith.constant 0 : i32
    %c0_i32_1 = arith.constant 0 : i32
    return %c0_i32, %c0_i32_0 : i32, i32
  }
  func.func @transform_11(%arg0: i32) -> (i32, i32) {
    %c0_i32 = arith.constant 0 : i32
    %c0_i32_0 = arith.constant 0 : i32
    %c0_i32_1 = arith.constant 0 : i32
    return %c0_i32, %c0_i32_0 : i32, i32
  }
  func.func @transform_12(%arg0: i32) -> (i32, i32) {
    %c0_i32 = arith.constant 0 : i32
    %c0_i32_0 = arith.constant 0 : i32
    %c0_i32_1 = arith.constant 0 : i32
    return %c0_i32, %c0_i32_0 : i32, i32
  }
  func.func @transform_13(%arg0: i32) -> (i32, i32) {
    %c0_i32 = arith.constant 0 : i32
    %c0_i32_0 = arith.constant 0 : i32
    %c0_i32_1 = arith.constant 0 : i32
    return %c0_i32, %c0_i32_0 : i32, i32
  }
  func.func @transform_14(%arg0: i32) -> (i32, i32) {
    %c0_i32 = arith.constant 0 : i32
    %c0_i32_0 = arith.constant 0 : i32
    %c0_i32_1 = arith.constant 0 : i32
    return %c0_i32, %c0_i32_0 : i32, i32
  }
  func.func @transform_15(%arg0: i32) -> (i32, i32) {
    %c0_i32 = arith.constant 0 : i32
    %c0_i32_0 = arith.constant 0 : i32
    %c0_i32_1 = arith.constant 0 : i32
    return %c0_i32, %c0_i32_0 : i32, i32
  }
  func.func @transform_16(%arg0: i32) -> (i32, i32) {
    %c0_i32 = arith.constant 0 : i32
    %c0_i32_0 = arith.constant 0 : i32
    %c0_i32_1 = arith.constant 0 : i32
    return %c0_i32, %c0_i32_0 : i32, i32
  }
  func.func @transform_17(%arg0: i32) -> (i32, i32) {
    %c0_i32 = arith.constant 0 : i32
    %c0_i32_0 = arith.constant 0 : i32
    %c0_i32_1 = arith.constant 0 : i32
    return %c0_i32, %c0_i32_0 : i32, i32
  }
  func.func @transform_18(%arg0: i32) -> (i32, i32) {
    %c0_i32 = arith.constant 0 : i32
    %c0_i32_0 = arith.constant 0 : i32
    %c0_i32_1 = arith.constant 0 : i32
    return %c0_i32, %c0_i32_0 : i32, i32
  }
  func.func @transform_19(%arg0: i32) -> (i32, i32, i32) {
    %c0_i32 = arith.constant 0 : i32
    %c0_i32_0 = arith.constant 0 : i32
    %c0_i32_1 = arith.constant 0 : i32
    return %arg0, %c0_i32, %c0_i32_0 : i32, i32, i32
  }
}

</mosaic_0001>

<bundles_post_ra>
// kernel: forward.1
= control target key start
LH: loop header
LB: loop body
LE: loop exit
PB: predicated region body
PF: predicated region fallthrough
CT: control target
= control target key end

     0   :  { %s3805_s0 = inlined_call_operand.vmem [shape: f32[2,8,4], index: 0, kind: input, shape index: {}]   ;;  %s3806_s1 = inlined_call_operand.vmem [shape: f32[4,32], index: 1, kind: input, shape index: {}]   ;;  %s3807_s2 = inlined_call_operand.vmem [shape: f32[1,32], index: 2, kind: input, shape index: {}]   ;;  %s3808_s3 = inlined_call_operand.vmem [shape: f32[32,16], index: 3, kind: input, shape index: {}]   ;;  %s3809_s4 = inlined_call_operand.vmem [shape: f32[1,16], index: 4, kind: input, shape index: {}]   ;;  %s3810_s5 = inlined_call_operand.vmem [shape: f32[16,64], index: 5, kind: input, shape index: {}]   ;;  %s3811_s6 = inlined_call_operand.vmem [shape: f32[4,32], index: 6, kind: input, shape index: {}]   ;;  %s3812_s7 = inlined_call_operand.vmem [shape: f32[1,32], index: 7, kind: input, shape index: {}]   ;;  %s3813_s8 = inlined_call_operand.vmem [shape: f32[32,8], index: 8, kind: input, shape index: {}]   ;;  %s3814_s9 = inlined_call_operand.vmem [shape: f32[32,8], index: 9, kind: input, shape index: {}]   ;;  %s3815_s10 = inlined_call_operand.vmem [shape: f32[32,32], index: 10, kind: input, shape index: {}]   ;;  %s3816_s11 = inlined_call_operand.vmem [shape: f32[1,32], index: 11, kind: input, shape index: {}]   ;;  %s3817_s12 = inlined_call_operand.vmem [shape: f32[8,32], index: 12, kind: input, shape index: {}]   ;;  %s3818_s13 = inlined_call_operand.vmem [shape: f32[1,32], index: 13, kind: input, shape index: {}]   ;;  %s3819_s14 = inlined_call_operand.vmem [shape: f32[32,16], index: 14, kind: input, shape index: {}]   ;;  %s3820_s15 = inlined_call_operand.vmem [shape: f32[16,32], index: 15, kind: input, shape index: {}]   ;;  %s3821_s16 = inlined_call_operand.vmem [shape: f32[1,32], index: 16, kind: input, shape index: {}]   ;;  %s3822_s17 = inlined_call_operand.vmem [shape: f32[32,4], index: 17, kind: input, shape index: {}]   ;;  %s3823_s18 = inlined_call_operand.vmem [shape: f32[1,4], index: 18, kind: input, shape index: {}]   ;;  %s3824_s19 = inlined_call_operand.vmem [shape: f32[2,8,4], index: 19, kind: output, shape index: {}]  }
   0x1   :  { %3826 = sst [smem:[#allocation2_spill]] %s3805_s0  ;;  %s3486_s0 = smov 0  }
   0x2   :  { %3827 = sst [smem:[#allocation3_spill]] %s3806_s1 }
   0x3   :  { %3828 = sst [smem:[#allocation4_spill]] %s3807_s2 }
   0x4   :  { %3829 = sst [smem:[#allocation5_spill]] %s3808_s3 }
   0x5 LB: > { %s3045_s30 = sadd.s32 4294967295, %s3381_s0   ;;  %p3049_p0 = scmp.ge.s32.totalorder %s3381_s0, 1  ;;  %s3381_s0 = sphi %s3486_s0, %s29_s0  }
   0x6   : > { %p536_p1 = scmp.lt.s32.totalorder %s3381_s0, 3 }
   0x8   : > { %p537_p2 = pnand %p3049_p0, %p536_p1 }
   0x9   : > { %s3830_s1 = sld [smem:[#allocation3_spill]] (!%p537_p2)  ;;  %p590_p3 = scmp.lt.s32.totalorder (!%p537_p2), %s3045_s30, 1 }
   0xa   : > { %540 = sbr.rel (%p537_p2) target bundleno = 1981 (0x7bd), region = 96  ;;  %s3831_s23 = sld [smem:[#allocation5_spill]] (!%p537_p2) }
   0xb   : > { %s3832_s26 = sld [smem:[#allocation2_spill]] (!%p537_p2)  ;;  %s3385_s25 = smov (!%p537_p2), 96  }
   0xc   : > { %s3833_s3 = sld [smem:[#allocation4_spill]] (!%p537_p2) }
   0xf   : > { %v599_v0 = vld [vmem:[%s3830_s1] sm:$0xf]  ;;  %vm611_vm0 = vcmask 1043456   ;;  %v3383_v1 = vmov 0.0   ;;  %vm3384_vm1 = vmmov 0   ;;  %s3835_s30 = smov (!%p590_p3, %s3045_s30), 1 }
  0x10   : > { %3171 = vmatprep.subr.mxu0 %v3383_v1  ;;  %3173 = vmatprep.mubr.msk.f32.mxu0 %vm3384_vm1, %v3383_v1  ;;  %v689_v2 = vld [vmem:[%s3831_s23 + $0x18] sm:$0xff]  ;;  %s3050_s24 = sshll.u32 %s3835_s30, 3  ;;  %vm607_vm2 = vcmask 31744   ;;  %v688_v4 = vld [vmem:[%s3831_s23 + $0x10] sm:$0xff]  ;;  %v687_v5 = vld [vmem:[%s3831_s23 + $0x8] sm:$0xff]  ;;  %vm697_vm3 = vcmask 261120  }
  0x11   : > { %3172 = vmatpush3.msk.msra.mxu0 %vm611_vm0, %v599_v0  ;;  %3176 = vmatprep.subr.mxu1 %v3383_v1  ;;  %s593_s27 = scalar_lea.vmem %s3832_s26, %s3050_s24  ;;  %v686_v6 = vld [vmem:[%s3831_s23] sm:$0xff]  ;;  %v772_v12 = vld [vmem:[%s3810_s5 + $0x8] sm:$0xff]  ;;  %vm773_vm4 = vcmask 130048   ;;  %v913_v18 = vld [vmem:[%s3813_s8 + $0x18] sm:$0xff]  ;;  %vm850_vm5 = vcmask 1042432   ;;  %vm874_vm6 = vcmask 1046528   ;;  %s597_s22 = scalar_lea.vmem %s3824_s19, %s3050_s24 }
  0x12   : > { %3177 = vmatpush3.msra.mxu1 %v689_v2  ;;  %3184 = vmatprep.mubr.msk.f32.mxu1 %vm3384_vm1, %v3383_v1  ;;  %v598_v3 = vld [vmem:[%s593_s27] sm:$0xff]  ;;  %v990_v19 = vld [vmem:[%s3814_s9 + $0x18] sm:$0xff]  ;;  %v912_v20 = vld [vmem:[%s3813_s8 + $0x10] sm:$0xff]  ;;  %vm889_vm7 = vcmask 1045504   ;;  %vm1250_vm10 = vcmask 1040384   ;;  %vm1246_vm11 = vcmask 7168  }
  0x13   : > { %3178 = vmatprep.subr.mxu1 %v3383_v1  ;;  %3187 = vmatprep.subr.mxu0 %v3383_v1  ;;  %v3052_v7 = vld [vmem:[%s3833_s3] ss:$0 sm:$0xff]  ;;  %v989_v21 = vld [vmem:[%s3814_s9 + $0x10] sm:$0xff]  ;;  %v911_v22 = vld [vmem:[%s3813_s8 + $0x8] sm:$0xff]  ;;  %vm2111_vm12 = vcmask 64512   ;;  %vm2718_vm13 = vcmask 1041408  }
  0x14   : > { %3174 = vmatmul.mubr.msk.f32.vlgmr.msra.gmra.mxu0 %vm607_vm2, %v598_v3  ;;  %3179 = vmatpush3.msra.mxu1 %v688_v4  ;;  %v771_v13 = vld [vmem:[%s3810_s5] sm:$0xff]  ;;  %v988_v23 = vld [vmem:[%s3814_s9 + $0x8] sm:$0xff]  ;;  %v1064_v56 = vld [vmem:[%s3815_s10 + $0x18] sm:$0xff]  ;;  %vm2722_vm14 = vcmask 1044480  }
  0x15   : > { %3191 = vmatprep.mubr.msk.f32.mxu0 %vm3384_vm1, %v3383_v1  ;;  %3180 = vmatprep.subr.mxu1 %v3383_v1  ;;  %v3055_v14 = vld [vmem:[%s3809_s4] ss:$0 sm:$0xff]  ;;  %v3060_v27 = vld [vmem:[%s3811_s6 + $0x1] ss:$0 sm:$0xff]  ;;  %v3061_v28 = vld [vmem:[%s3811_s6 + $0x2] ss:$0 sm:$0xff] }
  0x16   : > { %3181 = vmatpush3.msra.mxu1 %v687_v5  ;;  %3188 = vmatpush3.msra.mxu0 %v772_v12  ;;  %v910_v24 = vld [vmem:[%s3813_s8] sm:$0xff]  ;;  %v1063_v57 = vld [vmem:[%s3815_s10 + $0x10] sm:$0xff]  ;;  %v1062_v58 = vld [vmem:[%s3815_s10 + $0x8] sm:$0xff] }
  0x17   : > { %3182 = vmatprep.subr.mxu1 %v3383_v1  ;;  %3189 = vmatprep.subr.mxu0 %v3383_v1  ;;  %v987_v25 = vld [vmem:[%s3814_s9] sm:$0xff] }
  0x18   : > { %3183 = vmatpush3.msra.mxu1 %v686_v6  ;;  %3190 = vmatpush3.msra.mxu0 %v771_v13  ;;  %v3058_v30 = vld [vmem:[%s3811_s6 + $0x3] ss:$0 sm:$0xff]  ;;  %v3059_v31 = vld [vmem:[%s3811_s6] ss:$0 sm:$0xff] }
  0x19   : > { %3205 = vmatprep.subr.mxu1 %v3383_v1  ;;  %3194 = vmatprep.subr.mxu0 %v3383_v1  ;;  %v3062_v48 = vld [vmem:[%s3812_s7] ss:$0 sm:$0xff] }
  0x1a   : > { %v1061_v59 = vld [vmem:[%s3815_s10] sm:$0xff] }
  0x1b   : > { %v3066_v4 = vld [vmem:[%s3816_s11] ss:$0 sm:$0xff] }
  0xd4   : > { %v681_v8 = vpop.f32.mrf.mxu0 }
  0xd5   : > { %v682_v9 = vadd.f32 %v3052_v7, %v681_v8 }
  0xd6   : > { %v3175_v10 = vpop.f32.mrf.mxu0 }
  0xd7   : > { %v685_v11 = vmax.f32 %v682_v9, 0.0 }
  0xd9   : > { %3185 = vmatmul.mubr.msk.f32.vlgmr.msra.gmra.mxu1 %vm697_vm3, %v685_v11 }
  0xda   : > { %3213 = vmatprep.mubr.msk.f32.mxu1 %vm3384_vm1, %v3383_v1  ;;  %3206 = vmatpush3.msra.mxu1 %v990_v19 }
  0xdb   : > { %3207 = vmatprep.subr.mxu1 %v3383_v1 }
  0xdc   : > { %3208 = vmatpush3.msra.mxu1 %v989_v21 }
  0xdd   : > { %3209 = vmatprep.subr.mxu1 %v3383_v1 }
  0xde   : > { %3210 = vmatpush3.msra.mxu1 %v988_v23 }
  0xdf   : > { %3211 = vmatprep.subr.mxu1 %v3383_v1 }
  0xe0   : > { %3212 = vmatpush3.msra.mxu1 %v987_v25 }
  0xe1   : > { %3232 = vmatprep.subr.mxu1 %v3383_v1 }
 0x199   : > { %v767_v15 = vpop.f32.mrf.mxu1 }
 0x19a   : > { %v768_v16 = vadd.f32 %v3055_v14, %v767_v15 }
 0x19b   : > { %v3186_v17 = vpop.f32.mrf.mxu1 }
 0x19c   : > { %3192 = vmatmul.mubr.msk.f32.vlgmr.msra.gmra.mxu0 %vm773_vm4, %v768_v16 }
 0x19d   : > { %3202 = vmatprep.mubr.msk.f32.mxu0 %vm3384_vm1, %v3383_v1  ;;  %3195 = vmatpush3.msra.mxu0 %v913_v18 }
 0x19e   : > { %3196 = vmatprep.subr.mxu0 %v3383_v1 }
 0x19f   : > { %3197 = vmatpush3.msra.mxu0 %v912_v20 }
 0x1a0   : > { %3198 = vmatprep.subr.mxu0 %v3383_v1 }
 0x1a1   : > { %3199 = vmatpush3.msra.mxu0 %v911_v22 }
 0x1a2   : > { %3200 = vmatprep.subr.mxu0 %v3383_v1 }
 0x1a3   : > { %3201 = vmatpush3.msra.mxu0 %v910_v24 }
 0x1a4   : > { %3216 = vmatprep.subr.mxu0 %v3383_v1 }
 0x25c   : > { %v3584_v26 = vpop.f32.mrf.mxu0 }
 0x25d   : > { %v848_v29 = vrot.slane %v3584_v26, 5  ;;  %v857_v36 = vmul.f32 %v3058_v30, %v3584_v26  ;;  %v3093_v12 = vmul.f32 -1.442695, %v3584_v26 }
 0x25e   : > { %v3193_v32 = vpop.f32.mrf.mxu0 }
 0x25f   : > { %v851_v33 = vsel %vm850_vm5, 0.0, %v848_v29  ;;  %v871_v34 = vmul.f32 %v3060_v27, %v848_v29  ;;  %v886_v35 = vmul.f32 %v3061_v28, %v848_v29 }
 0x260   : > { %v863_v37 = vmul.f32 %v3059_v31, %v851_v33  ;;  %v870_v38 = vmul.f32 %v3060_v27, %v851_v33  ;;  %v885_v39 = vmul.f32 %v3061_v28, %v851_v33 }
 0x261   : > { %v876_v40 = vrot.slane %v871_v34, 1  ;;  %v891_v44 = vrot.slane %v886_v35, 2 }
 0x262   : > { %v864_v41 = vadd.f32 %v863_v37, %v857_v36  ;;  %v875_v42 = vrot.slane %v870_v38, 1  ;;  %v890_v43 = vrot.slane %v885_v39, 2 }
 0x264   : > { %v877_v45 = vsel %vm874_vm6, %v875_v42, %v876_v40  ;;  %v892_v47 = vsel %vm889_vm7, %v890_v43, %v891_v44 }
 0x265   : > { %v879_v46 = vadd.f32 %v877_v45, %v864_v41  ;;  %v1158_v45 = vlaneseq }
 0x267   : > { %v894_v49 = vadd.f32 %v892_v47, %v879_v46  ;;  %v1159_v46 = vshrl.u32 %v1158_v45, 7 }
 0x269   : > { %v902_v50 = vadd.f32 %v3062_v48, %v894_v49  ;;  %v1160_v47 = vsub.s32 0, %v1159_v46  ;;  %v1156_v49 = vld [vmem:[%s3817_s12] sm:$0xff] }
 0x26b   : > { %v3063_v51 = vmul.f32 -1.442695, %v902_v50 }
 0x26d   : > { %3347 = vpow2.f32 %v3063_v51 }
 0x27a   : > { %v3348_v52 = vpop.eup %3347 }
 0x27b   : > { %v906_v53 = vadd.f32 1.0, %v3348_v52 }
 0x27d   : > { %3349 = vrcp.f32 %v906_v53  ;;  %v1174_v53 = vsub.s32 2, %v1159_v46 }
 0x28a   : > { %v3350_v54 = vpop.eup %3349 }
 0x28b   : > { %v3606_v55 = vmul.f32 %v3350_v54, %v902_v50  ;;  %v1167_v50 = vsub.s32 1, %v1159_v46 }
 0x28d   : > { %3203 = vmatmul.mubr.msk.f32.vlgmr.msra.gmra.mxu0 %vm697_vm3, %v3606_v55  ;;  %3214 = vmatmul.mubr.msk.f32.vlgmr.msra.gmra.mxu1 %vm697_vm3, %v3606_v55 }
 0x28e   : > { %3217 = vmatpush3.msra.mxu0 %v1064_v56  ;;  %3224 = vmatprep.mubr.msk.f32.mxu0 %vm3384_vm1, %v3383_v1 }
 0x28f   : > { %3218 = vmatprep.subr.mxu0 %v3383_v1  ;;  %3234 = vmatprep.mubr.msk.f32.mxu1 %vm3384_vm1, %v3383_v1 }
 0x290   : > { %3219 = vmatpush3.msra.mxu0 %v1063_v57 }
 0x291   : > { %3220 = vmatprep.subr.mxu0 %v3383_v1 }
 0x292   : > { %3221 = vmatpush3.msra.mxu0 %v1062_v58  ;;  %v1181_v58 = vsub.s32 3, %v1159_v46 }
 0x293   : > { %3222 = vmatprep.subr.mxu0 %v3383_v1 }
 0x294   : > { %3223 = vmatpush3.msra.mxu0 %v1061_v59 }
 0x295   : > { %3225 = vmatmul.mubr.msk.f32.vlgmr.msra.gmra.mxu0 %vm697_vm3, %v3606_v55  ;;  %3227 = vmatprep.subr.mxu0 %v3383_v1 }
 0x296   : > { %3229 = vmatprep.mubr.msk.f32.mxu0 %vm3384_vm1, %v3383_v1 }
 0x34d   : > { %v983_v60 = vpop.f32.mrf.mxu0  ;;  %v3636_v61 = vpop.f32.mrf.mxu1 }
 0x34e   : > { %1214 = vxpose.xlu0.b32.start.end [1/1] (short) (narrow) %v983_v60, 8  ;;  %v1435_v62 = vrot.slane %v983_v60, 2  ;;  %v1325_v2 = vrot.slane %v983_v60, 1  ;;  %v1545_v3 = vrot.slane %v983_v60, 3  ;;  %v1655_v5 = vrot.slane %v983_v60, 4 }
 0x34f   : > { %v3204_v63 = vpop.f32.mrf.mxu0  ;;  %v3215_v0 = vpop.f32.mrf.mxu1  ;;  %v1765_v8 = vrot.slane %v983_v60, 5  ;;  %v1875_v11 = vrot.slane %v983_v60, 6  ;;  %v1985_v14 = vrot.slane %v983_v60, 7 }
 0x350   : > { %1437 = vxpose.xlu1.b32.start.end [1/1] (short) (narrow) %v1435_v62, 8  ;;  %v1188_v63 = vsub.s32 4, %v1159_v46  ;;  %v1195_v0 = vsub.s32 5, %v1159_v46 }
 0x352   : > { %1327 = vxpose.xlu0.b32.start.end [1/1] (short) (narrow) %v1325_v2, 8 }
 0x354   : > { %1547 = vxpose.xlu1.b32.start.end [1/1] (short) (narrow) %v1545_v3, 8 }
 0x355   : > { %v1138_v6 = vpop.f32.mrf.mxu0 }
 0x356   : > { %v1139_v7 = vadd.f32 %v3066_v4, %v1138_v6  ;;  %1657 = vxpose.xlu0.b32.start.end [1/1] (short) (narrow) %v1655_v5, 8  ;;  %v1202_v5 = vsub.s32 6, %v1159_v46 }
 0x357   : > { %v3226_v9 = vpop.f32.mrf.mxu0 }
 0x358   : > { %v1143_v10 = vmin.f32 %v1139_v7, 20.0  ;;  %1767 = vxpose.xlu1.b32.start.end [1/1] (short) (narrow) %v1765_v8, 8  ;;  %vm1142_vm9 = vcmp.gt.f32.partialorder %v1139_v7, 20.0 }
 0x35a   : > { %v1144_v13 = vmul.f32 1.442695, %v1143_v10  ;;  %1877 = vxpose.xlu0.b32.start.end [1/1] (short) (narrow) %v1875_v11, 8  ;;  %v1209_v11 = vsub.s32 7, %v1159_v46  ;;  %v2331_v46 = vrot.slane %v3636_v61, 3 }
 0x35c   : > { %3351 = vpow2.f32 %v1144_v13  ;;  %1987 = vxpose.xlu1.b32.start.end [1/1] (short) (narrow) %v1985_v14, 8 }
 0x35d   : > { %3353 = vpow2.f32 %v3093_v12 }
 0x369   : > { %v3352_v15 = vpop.eup %3351 }
 0x36a   : > { %v3354_v16 = vpop.eup %3353  ;;  %v1146_v17 = vadd.f32 1.0, %v3352_v15  ;;  %v1149_v19 = vmul.f32 -0.5, %v3352_v15  ;;  %v1152_v21 = vand.u32 2147483647, %v3352_v15 }
 0x36b   : > { %v2738_v18 = vadd.f32 1.0, %v3354_v16 }
 0x36c   : > { %3355 = vlog2.f32 %v1146_v17  ;;  %v1150_v20 = vadd.f32 1.0, %v1149_v19  ;;  %vm1153_vm8 = vcmp.lt.f32.partialorder %v1152_v21, 0.0004427343 }
 0x36d   : > { %3357 = vrcp.f32 %v2738_v18 }
 0x36e   : > { %v1151_v24 = vmul.f32 %v3352_v15, %v1150_v20 }
 0x379   : > { %v3356_v22 = vpop.eup %3355 }
 0x37a   : > { %v1148_v23 = vmul.f32 0.6931472, %v3356_v22  ;;  %v3358_v28 = vpop.eup %3357 }
 0x37b   : > { %v2741_v31 = vmul.f32 %v3358_v28, %v3584_v26 }
 0x37c   : > { %v1154_v25 = vsel %vm1153_vm8, %v1151_v24, %v1148_v23 }
 0x37d   : > { %v3642_v27 = vsel %vm1142_vm9, %v1139_v7, %v1154_v25 }
 0x37e   : > { %v1157_v29 = vmul.f32 %v3642_v27, %v3606_v55  ;;  %v1161_v48 = vrot.slane %v3642_v27, %v1160_v47  ;;  %v1168_v52 = vrot.slane %v3642_v27, %v1167_v50  ;;  %v1175_v57 = vrot.slane %v3642_v27, %v1174_v53 }
 0x37f   : > { %v1182_v62 = vrot.slane %v3642_v27, %v1181_v58  ;;  %v1189_v4 = vrot.slane %v3642_v27, %v1188_v63  ;;  %v1196_v8 = vrot.slane %v3642_v27, %v1195_v0  ;;  %v1203_v10 = vrot.slane %v3642_v27, %v1202_v5  ;;  %v2750_v5 = vld [vmem:[%s3819_s14 + $0x18] sm:$0xff] }
 0x380   : > { %3228 = vmatpush3.msk.msra.mxu0 %vm1250_vm10, %v1157_v29  ;;  %v1359_v30 = vrot.slane %v1157_v29, 1  ;;  %v1469_v33 = vrot.slane %v1157_v29, 2  ;;  %v1579_v35 = vrot.slane %v1157_v29, 3  ;;  %v1689_v36 = vrot.slane %v1157_v29, 4 }
 0x381   : > { %3237 = vmatprep.subr.mxu0 %v3383_v1  ;;  %v1799_v39 = vrot.slane %v1157_v29, 5  ;;  %v1909_v40 = vrot.slane %v1157_v29, 6  ;;  %v2019_v42 = vrot.slane %v1157_v29, 7  ;;  %v1162_v51 = vmul.f32 %v1161_v48, %v1156_v49 }
 0x382   : > { %3233 = vmatpush3.msk.msra.mxu1 %vm1250_vm10, %v1359_v30  ;;  %v1169_v56 = vmul.f32 %v1168_v52, %v1156_v49  ;;  %v1176_v60 = vmul.f32 %v1175_v57, %v1156_v49  ;;  %v1183_v3 = vmul.f32 %v1182_v62, %v1156_v49  ;;  %v1190_v7 = vmul.f32 %v1189_v4, %v1156_v49 }
 0x383   : > { %2743 = vrot.lane.b32.xlu0 %v2741_v31, %s3385_s25  ;;  %3242 = vmatprep.subr.mxu1 %v3383_v1  ;;  %v1163_v54 = vmul.f32 1.442695, %v1162_v51  ;;  %v1197_v13 = vmul.f32 %v1196_v8, %v1156_v49  ;;  %v1204_v16 = vmul.f32 %v1203_v10, %v1156_v49  ;;  %v1210_v17 = vrot.slane %v3642_v27, %v1209_v11  ;;  %v2747_v8 = vld [vmem:[%s3819_s14] sm:$0xff] }
 0x384   : > { %v1170_v59 = vmul.f32 1.442695, %v1169_v56  ;;  %v1177_v2 = vmul.f32 1.442695, %v1176_v60  ;;  %v1184_v6 = vmul.f32 1.442695, %v1183_v3 }
 0x385   : > { %3359 = vpow2.f32 %v1163_v54  ;;  %v1191_v12 = vmul.f32 1.442695, %v1190_v7  ;;  %v1198_v19 = vmul.f32 1.442695, %v1197_v13  ;;  %v1205_v27 = vmul.f32 1.442695, %v1204_v16 }
 0x386   : > { %3361 = vpow2.f32 %v1170_v59  ;;  %v1211_v28 = vmul.f32 %v1210_v17, %v1156_v49  ;;  %v2404_v53 = vrot.slane %v3636_v61, 4  ;;  %v2477_v59 = vrot.slane %v3636_v61, 5  ;;  %v2825_v7 = vld [vmem:[%s3820_s15 + $0x8] sm:$0xff] }
 0x387   : > { %3363 = vpow2.f32 %v1177_v2  ;;  %v2550_v0 = vrot.slane %v3636_v61, 6  ;;  %v2623_v4 = vrot.slane %v3636_v61, 7 }
 0x388   : > { %3365 = vpow2.f32 %v1184_v6  ;;  %v2749_v6 = vld [vmem:[%s3819_s14 + $0x10] sm:$0xff] }
 0x389   : > { %3367 = vpow2.f32 %v1191_v12 }
 0x38a   : > { %3369 = vpow2.f32 %v1198_v19 }
 0x38b   : > { %3371 = vpow2.f32 %v1205_v27 }
 0x392   : > { %v3360_v9 = vpop.eup %3359 }
 0x393   : > { %v2095_v14 = vmul.f32 0.0, %v3360_v9  ;;  %v3362_v20 = vpop.eup %3361 }
 0x394   : > { %v3364_v29 = vpop.eup %3363 }
 0x3ca   : > { %v1230_v32 = vpop.trf.xlu0 }
 0x3cb   : > { %3230 = vmatmul.mubr.msk.f32.vlgmr.msra.gmra.mxu0 %vm1246_vm11, %v1230_v32  ;;  %v2185_v32 = vrot.slane %v3636_v61, 1 }
 0x3cc   : > { %3238 = vmatpush3.msk.msra.mxu0 %vm1250_vm10, %v1469_v33  ;;  %v1453_v34 = vpop.trf.xlu1  ;;  %3239 = vmatprep.mubr.msk.f32.mxu0 %vm3384_vm1, %v3383_v1 }
 0x3cd   : > { %3247 = vmatprep.subr.mxu0 %v3383_v1 }
 0x3ce   : > { %v1343_v26 = vpop.trf.xlu0 }
 0x3cf   : > { %3235 = vmatmul.mubr.msk.f32.vlgmr.msra.gmra.mxu1 %vm1246_vm11, %v1343_v26  ;;  %3240 = vmatmul.mubr.msk.f32.vlgmr.msra.gmra.mxu0 %vm1246_vm11, %v1453_v34 }
 0x3d0   : > { %3243 = vmatpush3.msk.msra.mxu1 %vm1250_vm10, %v1579_v35  ;;  %3248 = vmatpush3.msk.msra.mxu0 %vm1250_vm10, %v1689_v36  ;;  %v1563_v37 = vpop.trf.xlu1  ;;  %v1212_v36 = vmul.f32 1.442695, %v1211_v28 }
 0x3d1   : > { %3244 = vmatprep.mubr.msk.f32.mxu1 %vm3384_vm1, %v3383_v1  ;;  %3249 = vmatprep.mubr.msk.f32.mxu0 %vm3384_vm1, %v3383_v1 }
 0x3d2   : > { %v1673_v38 = vpop.trf.xlu0  ;;  %3252 = vmatprep.subr.mxu1 %v3383_v1  ;;  %3257 = vmatprep.subr.mxu0 %v3383_v1  ;;  %3373 = vpow2.f32 %v1212_v36 }
 0x3d3   : > { %3245 = vmatmul.mubr.msk.f32.vlgmr.msra.gmra.mxu1 %vm1246_vm11, %v1563_v37  ;;  %3250 = vmatmul.mubr.msk.f32.vlgmr.msra.gmra.mxu0 %vm1246_vm11, %v1673_v38  ;;  %v3366_v37 = vpop.eup %3365 }
 0x3d4   : > { %3253 = vmatpush3.msk.msra.mxu1 %vm1250_vm10, %v1799_v39  ;;  %3258 = vmatpush3.msk.msra.mxu0 %vm1250_vm10, %v1909_v40  ;;  %v1783_v41 = vpop.trf.xlu1  ;;  %v2258_v39 = vrot.slane %v3636_v61, 2  ;;  %v3368_v45 = vpop.eup %3367 }
 0x3d5   : > { %3254 = vmatprep.mubr.msk.f32.mxu1 %vm3384_vm1, %v3383_v1  ;;  %3262 = vmatprep.subr.mxu1 %v3383_v1  ;;  %v3370_v52 = vpop.eup %3369 }
 0x3d6   : > { %v1893_v43 = vpop.trf.xlu0  ;;  %3259 = vmatprep.mubr.msk.f32.mxu0 %vm3384_vm1, %v3383_v1  ;;  %3267 = vmatprep.subr.mxu0 %v3383_v1  ;;  %v3372_v58 = vpop.eup %3371 }
 0x3d7   : > { %3255 = vmatmul.mubr.msk.f32.vlgmr.msra.gmra.mxu1 %vm1246_vm11, %v1783_v41  ;;  %3260 = vmatmul.mubr.msk.f32.vlgmr.msra.gmra.mxu0 %vm1246_vm11, %v1893_v43 }
 0x3d8   : > { %3263 = vmatpush3.msk.msra.mxu1 %vm1250_vm10, %v2019_v42  ;;  %v2003_v44 = vpop.trf.xlu1  ;;  %3264 = vmatprep.mubr.msk.f32.mxu1 %vm3384_vm1, %v3383_v1 }
 0x3d9   : > { %3269 = vmatprep.mubr.msk.f32.mxu0 %vm3384_vm1, %v3383_v1  ;;  %3272 = vmatprep.subr.mxu1 %v3383_v1 }
 0x3db   : > { %3265 = vmatmul.mubr.msk.f32.vlgmr.msra.gmra.mxu1 %vm1246_vm11, %v2003_v44 }
 0x3dc   : > { %3274 = vmatprep.mubr.msk.f32.mxu1 %vm3384_vm1, %v3383_v1 }
 0x3df   : > { %v3374_v63 = vpop.eup %3373 }
 0x48b   : > { %v1320_v15 = vpop.f32.mrf.mxu0 }
 0x48c   : > { %v2096_v18 = vadd.f32 %v2095_v14, %v1320_v15 }
 0x48d   : > { %v3231_v21 = vpop.f32.mrf.mxu0 }
 0x48e   : > { %3268 = vmatpush3.msra.mxu0 %v2096_v18  ;;  %v2097_v22 = vmul.f32 %v3362_v20, %v2096_v18 }
 0x48f   : > { %v1431_v23 = vpop.f32.mrf.mxu1  ;;  %3270 = vmatmul.mubr.msk.f32.vlgmr.msra.gmra.mxu0 %vm2111_vm12, %v3636_v61  ;;  %v1541_v24 = vpop.f32.mrf.mxu0  ;;  %3277 = vmatprep.subr.mxu0 %v3383_v1  ;;  %v2748_v61 = vld [vmem:[%s3819_s14 + $0x8] sm:$0xff] }
 0x490   : > { %v2098_v25 = vadd.f32 %v2097_v22, %v1431_v23  ;;  %3279 = vmatprep.mubr.msk.f32.mxu0 %vm3384_vm1, %v3383_v1 }
 0x491   : > { %v3236_v30 = vpop.f32.mrf.mxu1  ;;  %v3241_v31 = vpop.f32.mrf.mxu0 }
 0x492   : > { %v2099_v33 = vmul.f32 %v3364_v29, %v2098_v25  ;;  %3273 = vmatpush3.msra.mxu1 %v2098_v25 }
 0x493   : > { %3275 = vmatmul.mubr.msk.f32.vlgmr.msra.gmra.mxu1 %vm2111_vm12, %v2185_v32  ;;  %v1651_v34 = vpop.f32.mrf.mxu1  ;;  %v1761_v26 = vpop.f32.mrf.mxu0  ;;  %3282 = vmatprep.subr.mxu1 %v3383_v1 }
 0x494   : > { %v2100_v35 = vadd.f32 %v2099_v33, %v1541_v24  ;;  %3284 = vmatprep.mubr.msk.f32.mxu1 %vm3384_vm1, %v3383_v1  ;;  %v3092_v33 = vld [vmem:[%s3818_s13] ss:$0 sm:$0xff] }
 0x495   : > { %v3246_v38 = vpop.f32.mrf.mxu1  ;;  %v3251_v40 = vpop.f32.mrf.mxu0 }
 0x496   : > { %v2101_v41 = vmul.f32 %v3366_v37, %v2100_v35  ;;  %3278 = vmatpush3.msra.mxu0 %v2100_v35  ;;  %v2733_v38 = vmul.f32 %v3092_v33, %v3606_v55 }
 0x497   : > { %3280 = vmatmul.mubr.msk.f32.vlgmr.msra.gmra.mxu0 %vm2111_vm12, %v2258_v39  ;;  %v1871_v42 = vpop.f32.mrf.mxu1  ;;  %3287 = vmatprep.subr.mxu0 %v3383_v1  ;;  %v1981_v43 = vpop.f32.mrf.mxu0 }
 0x498   : > { %v2102_v44 = vadd.f32 %v2101_v41, %v1651_v34  ;;  %3289 = vmatprep.mubr.msk.f32.mxu0 %vm3384_vm1, %v3383_v1 }
 0x499   : > { %v3256_v47 = vpop.f32.mrf.mxu1  ;;  %v3261_v48 = vpop.f32.mrf.mxu0 }
 0x49a   : > { %v2103_v49 = vmul.f32 %v3368_v45, %v2102_v44  ;;  %3283 = vmatpush3.msra.mxu1 %v2102_v44  ;;  %v2824_v44 = vld [vmem:[%s3820_s15] sm:$0xff]  ;;  %v2910_v45 = vld [vmem:[%s3822_s17 + $0x18] sm:$0xff]  ;;  %v2909_v47 = vld [vmem:[%s3822_s17 + $0x10] sm:$0xff] }
 0x49b   : > { %3285 = vmatmul.mubr.msk.f32.vlgmr.msra.gmra.mxu1 %vm2111_vm12, %v2331_v46  ;;  %3292 = vmatprep.subr.mxu1 %v3383_v1  ;;  %v2091_v50 = vpop.f32.mrf.mxu1  ;;  %v2908_v48 = vld [vmem:[%s3822_s17 + $0x8] sm:$0xff] }
 0x49c   : > { %v2104_v51 = vadd.f32 %v2103_v49, %v1761_v26  ;;  %3294 = vmatprep.mubr.msk.f32.mxu1 %vm3384_vm1, %v3383_v1  ;;  %v2907_v49 = vld [vmem:[%s3822_s17] sm:$0xff] }
 0x49d   : > { %v3266_v54 = vpop.f32.mrf.mxu1 }
 0x49e   : > { %v2105_v56 = vmul.f32 %v3370_v52, %v2104_v51  ;;  %3288 = vmatpush3.msra.mxu0 %v2104_v51 }
 0x49f   : > { %3290 = vmatmul.mubr.msk.f32.vlgmr.msra.gmra.mxu0 %vm2111_vm12, %v2404_v53  ;;  %3297 = vmatprep.subr.mxu0 %v3383_v1 }
 0x4a0   : > { %v2106_v57 = vadd.f32 %v2105_v56, %v1871_v42  ;;  %3299 = vmatprep.mubr.msk.f32.mxu0 %vm3384_vm1, %v3383_v1  ;;  %v2744_v42 = vpop.permute.xlu0 %2743  ;;  %v3097_v56 = vld [vmem:[%s3823_s18] ss:$0 sm:$0xff] }
 0x4a2   : > { %v2107_v60 = vmul.f32 %v3372_v58, %v2106_v57  ;;  %3293 = vmatpush3.msra.mxu1 %v2106_v57 }
 0x4a3   : > { %3295 = vmatmul.mubr.msk.f32.vlgmr.msra.gmra.mxu1 %vm2111_vm12, %v2477_v59  ;;  %3302 = vmatprep.subr.mxu1 %v3383_v1 }
 0x4a4   : > { %v2108_v62 = vadd.f32 %v2107_v60, %v1981_v43  ;;  %3304 = vmatprep.mubr.msk.f32.mxu1 %vm3384_vm1, %v3383_v1 }
 0x4a6   : > { %v2109_v2 = vmul.f32 %v3374_v63, %v2108_v62  ;;  %3298 = vmatpush3.msra.mxu0 %v2108_v62 }
 0x4a7   : > { %3300 = vmatmul.mubr.msk.f32.vlgmr.msra.gmra.mxu0 %vm2111_vm12, %v2550_v0  ;;  %3307 = vmatprep.subr.mxu0 %v3383_v1 }
 0x4a8   : > { %v2110_v3 = vadd.f32 %v2109_v2, %v2091_v50  ;;  %3315 = vmatprep.mubr.msk.f32.mxu0 %vm3384_vm1, %v3383_v1  ;;  %3308 = vmatpush3.msra.mxu0 %v2750_v5  ;;  %v3095_v50 = vld [vmem:[%s3821_s16] ss:$0 sm:$0xff] }
 0x4a9   : > { %3309 = vmatprep.subr.mxu0 %v3383_v1 }
 0x4aa   : > { %3303 = vmatpush3.msra.mxu1 %v2110_v3  ;;  %3310 = vmatpush3.msra.mxu0 %v2749_v6 }
 0x4ab   : > { %3305 = vmatmul.mubr.msk.f32.vlgmr.msra.gmra.mxu1 %vm2111_vm12, %v2623_v4  ;;  %3318 = vmatprep.subr.mxu1 %v3383_v1 }
 0x4ac   : > { %3322 = vmatprep.mubr.msk.f32.mxu1 %vm3384_vm1, %v3383_v1  ;;  %3319 = vmatpush3.msra.mxu1 %v2825_v7 }
 0x4ad   : > { %3311 = vmatprep.subr.mxu0 %v3383_v1  ;;  %3320 = vmatprep.subr.mxu1 %v3383_v1 }
 0x4ae   : > { %3312 = vmatpush3.msra.mxu0 %v2748_v61  ;;  %3321 = vmatpush3.msra.mxu1 %v2824_v44 }
 0x4af   : > { %3313 = vmatprep.subr.mxu0 %v3383_v1  ;;  %3325 = vmatprep.subr.mxu1 %v3383_v1 }
 0x4b0   : > { %3314 = vmatpush3.msra.mxu0 %v2747_v8 }
 0x54f   : > { %v2181_v9 = vpop.f32.mrf.mxu0 }
 0x551   : > { %v3271_v10 = vpop.f32.mrf.mxu0 }
 0x553   : > { %v2254_v11 = vpop.f32.mrf.mxu1 }
 0x554   : > { %v2697_v20 = vrot.slane %v2254_v11, 7 }
 0x555   : > { %v3276_v12 = vpop.f32.mrf.mxu1 }
 0x556   : > { %v2717_v27 = vsel %vm1250_vm10, %v2181_v9, %v2697_v20 }
 0x557   : > { %v2327_v13 = vpop.f32.mrf.mxu0 }
 0x558   : > { %v2700_v21 = vrot.slane %v2327_v13, 6 }
 0x559   : > { %v3281_v14 = vpop.f32.mrf.mxu0 }
 0x55a   : > { %v2719_v29 = vsel %vm2718_vm13, %v2717_v27, %v2700_v21 }
 0x55b   : > { %v2400_v15 = vpop.f32.mrf.mxu1 }
 0x55c   : > { %v2703_v23 = vrot.slane %v2400_v15, 5 }
 0x55d   : > { %v3286_v16 = vpop.f32.mrf.mxu1 }
 0x55e   : > { %v2720_v32 = vsel %vm850_vm5, %v2719_v29, %v2703_v23 }
 0x55f   : > { %v2473_v17 = vpop.f32.mrf.mxu0 }
 0x560   : > { %v2706_v24 = vrot.slane %v2473_v17, 4 }
 0x561   : > { %v3291_v18 = vpop.f32.mrf.mxu0 }
 0x562   : > { %v2721_v34 = vsel %vm611_vm0, %v2720_v32, %v2706_v24 }
 0x563   : > { %v2546_v19 = vpop.f32.mrf.mxu1 }
 0x564   : > { %v2709_v28 = vrot.slane %v2546_v19, 3 }
 0x565   : > { %v3296_v22 = vpop.f32.mrf.mxu1 }
 0x566   : > { %v2723_v35 = vsel %vm2722_vm14, %v2721_v34, %v2709_v28 }
 0x567   : > { %v2619_v25 = vpop.f32.mrf.mxu0 }
 0x568   : > { %v2712_v30 = vrot.slane %v2619_v25, 2 }
 0x569   : > { %v3301_v31 = vpop.f32.mrf.mxu0 }
 0x56a   : > { %v2724_v37 = vsel %vm889_vm7, %v2723_v35, %v2712_v30 }
 0x56b   : > { %v2692_v26 = vpop.f32.mrf.mxu1 }
 0x56c   : > { %v2715_v36 = vrot.slane %v2692_v26, 1 }
 0x56d   : > { %v3306_v39 = vpop.f32.mrf.mxu1 }
 0x56e   : > { %v2725_v40 = vsel %vm874_vm6, %v2724_v37, %v2715_v36 }
 0x56f   : > { %v2734_v41 = vadd.f32 %v2733_v38, %v2725_v40 }
 0x571   : > { %v2746_v43 = vmul.f32 %v2744_v42, %v2734_v41 }
 0x573   : > { %3316 = vmatmul.mubr.msk.f32.vlgmr.msra.gmra.mxu0 %vm697_vm3, %v2746_v43 }
 0x633   : > { %v2820_v55 = vpop.f32.mrf.mxu0 }
 0x634   : > { %3323 = vmatmul.mubr.msk.f32.vlgmr.msra.gmra.mxu1 %vm773_vm4, %v2820_v55 }
 0x635   : > { %v3317_v46 = vpop.f32.mrf.mxu0  ;;  %3326 = vmatpush3.msra.mxu1 %v2910_v45  ;;  %3333 = vmatprep.mubr.msk.f32.mxu1 %vm3384_vm1, %v3383_v1 }
 0x636   : > { %3327 = vmatprep.subr.mxu1 %v3383_v1 }
 0x637   : > { %3328 = vmatpush3.msra.mxu1 %v2909_v47 }
 0x638   : > { %3329 = vmatprep.subr.mxu1 %v3383_v1 }
 0x639   : > { %3330 = vmatpush3.msra.mxu1 %v2908_v48 }
 0x63a   : > { %3331 = vmatprep.subr.mxu1 %v3383_v1 }
 0x63b   : > { %3332 = vmatpush3.msra.mxu1 %v2907_v49 }
 0x6f4   : > { %v2902_v51 = vpop.f32.mrf.mxu1 }
 0x6f5   : > { %v2903_v52 = vadd.f32 %v3095_v50, %v2902_v51 }
 0x6f6   : > { %v3324_v53 = vpop.f32.mrf.mxu1 }
 0x6f7   : > { %v2906_v54 = vmax.f32 %v2903_v52, 0.0 }
 0x6f9   : > { %3334 = vmatmul.mubr.msk.f32.vlgmr.msra.gmra.mxu1 %vm697_vm3, %v2906_v54 }
 0x7b9   : > { %v2987_v1 = vpop.f32.mrf.mxu1 }
 0x7ba   : > { %v2988_v57 = vadd.f32 %v3097_v56, %v2987_v1 }
 0x7bb   : > { %v3335_v58 = vpop.f32.mrf.mxu1 }
 0x7bc   : > { %2991 = vst.msk [vmem:[%s597_s22] sm:$0xff] %vm607_vm2, %v2988_v57 }
 0x7bd PF: > { %s29_s0 = sadd.s32 1, %s3381_s0  }
 0x7be   : > { %p26_p4 = scmp.ge.s32.totalorder %s29_s0, 4  }
 0x7c0   :  { %28 = sbr.rel (!%p26_p4) target bundleno = 5 (0x5), region = 126 }

</bundles_post_ra>
